<compile_context>
chip_gen: v7x
topology: tpu7x:2x2x1
jax: 0.10.0
libtpu: 0.0.40
codegen_flags: <defaults>
</compile_context>

<pallas_src>
import numpy as np
import jax
import jax.numpy as jnp
from jax import lax
from jax.experimental import pallas as pl
from jax.experimental.pallas import tpu as pltpu

# ---- model / layout constants --------------------------------------------------------------
B, C_IN, H, W = 2, 4, 16, 16
KK = 9                        # 3x3 taps
C_PAD = 8                     # input channels padded to 8 sublanes
C_MID = 8                     # backbone output channels
HIDDEN = 32                   # landmark feature dim
NUM_LM = 8                    # number of landmarks

IMG = H * W                   # 256 positions per image (power of two)
POS = B * IMG                 # 512 flat output positions (4 x 128 lanes)
MARGIN = 128                  # zero margin so every tap shift is a static in-bounds slice
XT_COLS = MARGIN + POS + MARGIN   # 768 = 6 x 128
KC = 80                       # stacked conv K: 72 tap rows + 1 ones (bias) row + 7 zero rows
W_SHIFT = 4                   # W  == 1 << 4
IMG_SHIFT = 8                 # IMG == 1 << 8

OUT_ROWS, LANES = 8, 128      # lane-dense padded output slab

# packed bf16 weight-slab row/col offsets
BIAS_COL = KK * C_PAD         # 72 : conv bias column (pairs with the ones row of im2col)
FC_W_ROW = 8                  # w_fc   [C_MID, HIDDEN]
HEAD_W_ROW = 16               # w_head [HIDDEN, 128] (vis | lm | zeros)
B_FC_ROW = 48                 # b_fc   row [1, HIDDEN]
B_HEAD_ROW = 49               # b_head row [1, 128]
W_ROWS = 56

FLOPS = 2 * (C_MID * KC * POS + OUT_ROWS * C_MID * POS
             + OUT_ROWS * C_MID * HIDDEN + OUT_ROWS * HIDDEN * LANES)
BYTES = B * C_IN * H * W * 4 + W_ROWS * LANES * 2 + OUT_ROWS * LANES * 4


# ---- the fused kernel -----------------------------------------------------------------------
def _landmark_kernel(x_ref, w_ref, out_ref, xt_ref, imcol_ref):
    f32 = jnp.float32
    bf16 = jnp.bfloat16

    # --- fused input prep: [B*C_IN, H*W] -> zero-margined [C_PAD, XT_COLS] staging slab ------
    xt_ref[...] = jnp.zeros((C_PAD, XT_COLS), f32)
    for b in range(B):                                           # static unroll (B = 2)
        xt_ref[0:C_IN, MARGIN + b * IMG:MARGIN + (b + 1) * IMG] = (
            x_ref[b * C_IN:(b + 1) * C_IN, :])

    # --- in-kernel im2col: 9 shifted, border-masked slices -> [KC, POS] f32 scratch ----------
    qi = lax.broadcasted_iota(jnp.int32, (C_PAD, POS), 1)        # flat output position q
    yq = (qi >> W_SHIFT) & (H - 1)                               # output row within the image
    xq = qi & (W - 1)                                            # output col within the image
    for k in range(KK):                                          # static unroll
        dy, dx = divmod(k, 3)
        start = MARGIN + (dy - 1) * W + (dx - 1)                 # static shift of the slab
        v = xt_ref[:, start:start + POS]                         # [C_PAD, POS]
        conds = []
        if dy == 0:
            conds.append(yq >= 1)
        if dy == 2:
            conds.append(yq <= H - 2)
        if dx == 0:
            conds.append(xq >= 1)
        if dx == 2:
            conds.append(xq <= W - 2)
        if conds:                                                # zero out-of-image taps
            m = conds[0]
            for c in conds[1:]:
                m = m & c
            v = jnp.where(m, v, 0.0)
        imcol_ref[k * C_PAD:(k + 1) * C_PAD, :] = v
    # row 72 = ones (carries the conv bias through the matmul); rows 73..79 = zeros
    sub = lax.broadcasted_iota(jnp.int32, (C_PAD, POS), 0)
    imcol_ref[KK * C_PAD:KC, :] = jnp.where(sub == 0, 1.0, 0.0).astype(f32)

    # --- conv3x3 + bias + ReLU as ONE stacked-K bf16 MXU matmul -------------------------------
    conv_t = jnp.maximum(
        jnp.dot(w_ref[0:C_MID, 0:KC], imcol_ref[...].astype(bf16),
                preferred_element_type=f32), 0.0)                # [C_MID, POS] f32

    # --- global average pool as one matmul against an iota-built per-batch selector ----------
    ri = lax.broadcasted_iota(jnp.int32, (OUT_ROWS, POS), 0)
    ci = lax.broadcasted_iota(jnp.int32, (OUT_ROWS, POS), 1)
    sel = jnp.where((ci >> IMG_SHIFT) == ri, 1.0 / IMG, 0.0).astype(bf16)
    feat = lax.dot_general(sel, conv_t.astype(bf16),
                           dimension_numbers=(((1,), (1,)), ((), ())),
                           preferred_element_type=f32)           # [OUT_ROWS, C_MID]

    # --- landmark feature extractor: FC + ReLU ------------------------------------------------
    h = jnp.maximum(
        jnp.dot(feat.astype(bf16), w_ref[FC_W_ROW:FC_W_ROW + C_MID, 0:HIDDEN],
                preferred_element_type=f32)
        + w_ref[B_FC_ROW:B_FC_ROW + 1, 0:HIDDEN].astype(f32), 0.0)   # [OUT_ROWS, HIDDEN]

    # --- fused visibility + landmark heads: one [HIDDEN, 128] matmul --------------------------
    head = (jnp.dot(h.astype(bf16), w_ref[HEAD_W_ROW:HEAD_W_ROW + HIDDEN, :],
                    preferred_element_type=f32)
            + w_ref[B_HEAD_ROW:B_HEAD_ROW + 1, :].astype(f32))       # [OUT_ROWS, 128]

    # sigmoid only on the visibility lanes (0..NUM_LM-1); exact reciprocal per review note
    lane = lax.broadcasted_iota(jnp.int32, (OUT_ROWS, LANES), 1)
    sig = pl.reciprocal(1.0 + jnp.exp(-head), approx=False)
    out_ref[...] = jnp.where(lane < NUM_LM, sig, head)              # one dense [8,128] store


# ---- host-side glue --------------------------------------------------------------------------
def pack_params(p):
    """Pack every weight/bias into one compact [W_ROWS, 128] bf16 slab."""
    w = np.zeros((W_ROWS, LANES), np.float32)
    for k in range(KK):
        # stacked conv LHS: w[c_out, k*8 + c_in] = w_conv[k, c_in, c_out]
        w[0:C_MID, k * C_PAD:k * C_PAD + C_IN] = np.asarray(p["w_conv"][k]).T
    w[0:C_MID, BIAS_COL] = np.asarray(p["b_conv"])
    w[FC_W_ROW:FC_W_ROW + C_MID, 0:HIDDEN] = np.asarray(p["w_fc"])
    w[HEAD_W_ROW:HEAD_W_ROW + HIDDEN, 0:NUM_LM] = np.asarray(p["w_vis"])
    w[HEAD_W_ROW:HEAD_W_ROW + HIDDEN, NUM_LM:3 * NUM_LM] = np.asarray(p["w_lm"])
    w[B_FC_ROW, 0:HIDDEN] = np.asarray(p["b_fc"])
    w[B_HEAD_ROW, 0:NUM_LM] = np.asarray(p["b_vis"])
    w[B_HEAD_ROW, NUM_LM:3 * NUM_LM] = np.asarray(p["b_lm"])
    return jnp.asarray(w, dtype=jnp.bfloat16)


@jax.jit
def landmark_forward(x, w_packed):
    # Free reshape of contiguous NCHW; ALL layout prep happens inside the kernel.
    x2d = x.reshape(B * C_IN, H * W)
    out = pl.pallas_call(
        _landmark_kernel,
        out_shape=jax.ShapeDtypeStruct((OUT_ROWS, LANES), jnp.float32),
        in_specs=[pl.BlockSpec(memory_space=pltpu.MemorySpace.VMEM),
                  pl.BlockSpec(memory_space=pltpu.MemorySpace.VMEM)],
        out_specs=pl.BlockSpec(memory_space=pltpu.MemorySpace.VMEM),
        scratch_shapes=[pltpu.VMEM((C_PAD, XT_COLS), jnp.float32),   # staging slab
                        pltpu.VMEM((KC, POS), jnp.float32)],         # stacked-K im2col
        cost_estimate=pl.CostEstimate(flops=FLOPS,
                                      transcendentals=OUT_ROWS * LANES,
                                      bytes_accessed=BYTES),
    )(x2d, w_packed)
    pred_vis = out[:B, :NUM_LM]                                   # [B, NUM_LM]
    pred_lm = out[:B, NUM_LM:3 * NUM_LM].reshape(B, NUM_LM, 2)    # [B, NUM_LM, 2]
    return pred_vis, pred_lm


# ---- pure-JAX reference (same synthetic weights, f32) for a numerical self-check -------------
def landmark_reference(x, p):
    xp = jnp.pad(x, ((0, 0), (0, 0), (1, 1), (1, 1)))
    conv = jnp.zeros((B, H, W, C_MID), jnp.float32)
    for k in range(KK):
        dy, dx = divmod(k, 3)
        patch = xp[:, :, dy:dy + H, dx:dx + W]                    # [B, C, H, W]
        conv = conv + jnp.einsum("bchw,cm->bhwm", patch, p["w_conv"][k])
    conv = jnp.maximum(conv + p["b_conv"], 0.0)
    feat = conv.mean(axis=(1, 2))                                 # [B, C_MID]
    h = jnp.maximum(feat @ p["w_fc"] + p["b_fc"], 0.0)
    vis = jax.nn.sigmoid(h @ p["w_vis"] + p["b_vis"])
    lm = (h @ p["w_lm"] + p["b_lm"]).reshape(B, NUM_LM, 2)
    return vis, lm


def init_params(key):
    ks = jax.random.split(key, 4)
    s = 0.1
    return {
        "w_conv": s * jax.random.normal(ks[0], (KK, C_IN, C_MID), jnp.float32),
        "b_conv": jnp.zeros((C_MID,), jnp.float32),
        "w_fc":   s * jax.random.normal(ks[1], (C_MID, HIDDEN), jnp.float32),
        "b_fc":   0.01 * jnp.ones((HIDDEN,), jnp.float32),
        "w_vis":  s * jax.random.normal(ks[2], (HIDDEN, NUM_LM), jnp.float32),
        "b_vis":  jnp.zeros((NUM_LM,), jnp.float32),
        "w_lm":   s * jax.random.normal(ks[3], (HIDDEN, 2 * NUM_LM), jnp.float32),
        "b_lm":   jnp.zeros((2 * NUM_LM,), jnp.float32),
    }


if __name__ == "__main__":
    x = jax.random.normal(jax.random.PRNGKey(0), (B, C_IN, H, W), jnp.float32)
    params = init_params(jax.random.PRNGKey(42))
    w_packed = pack_params(params)

    pred_vis, pred_lm = landmark_forward(x, w_packed)
    jax.block_until_ready((pred_vis, pred_lm))

    assert pred_vis.shape == (B, NUM_LM) and pred_vis.dtype == jnp.float32
    assert pred_lm.shape == (B, NUM_LM, 2) and pred_lm.dtype == jnp.float32
    assert bool(jnp.all(jnp.isfinite(pred_vis))) and bool(jnp.all(jnp.isfinite(pred_lm)))

    with jax.default_matmul_precision("float32"):
        ref_vis, ref_lm = landmark_reference(x, params)
    assert bool(jnp.allclose(pred_vis, ref_vis, atol=5e-3, rtol=5e-3))
    assert bool(jnp.allclose(pred_lm, ref_lm, atol=5e-3, rtol=5e-3))

    print("KERNEL_OK")
</pallas_src>

<mosaic_0001>
module attributes {stable_mosaic.version = 11 : i64} {
  func.func @_landmark_kernel(%arg0: memref<8x256xf32, #tpu.memory_space<vmem>>, %arg1: memref<56x128xbf16, #tpu.memory_space<vmem>>, %arg2: memref<8x128xf32, #tpu.memory_space<vmem>>, %arg3: memref<8x768xf32, #tpu.memory_space<vmem>>, %arg4: memref<80x512xf32, #tpu.memory_space<vmem>>) attributes {dimension_semantics = [], scalar_prefetch = 0 : i64, scratch_operands = 2 : i64, tpu.core_type = #tpu.core_type<tc>} {
    %cst = arith.constant 0.000000e+00 : f32
    %0 = vector.broadcast %cst : f32 to vector<8x768xf32>
    %c0 = arith.constant 0 : index
    %c0_0 = arith.constant 0 : index
    %1 = vector.load %arg3[%c0, %c0_0] : memref<8x768xf32, #tpu.memory_space<vmem>>, vector<8x768xf32>
    tpu.vector_store %arg3[%c0, %c0_0], %0 {strides = array<i32>} : memref<8x768xf32, #tpu.memory_space<vmem>>, vector<8x768xf32>,
    %c0_1 = arith.constant 0 : index
    %c0_2 = arith.constant 0 : index
    %2 = vector.load %arg0[%c0_1, %c0_2] : memref<8x256xf32, #tpu.memory_space<vmem>>, vector<4x256xf32>
    %c0_3 = arith.constant 0 : index
    %c128 = arith.constant 128 : index
    %3 = vector.load %arg3[%c0_3, %c128] : memref<8x768xf32, #tpu.memory_space<vmem>>, vector<4x256xf32>
    tpu.vector_store %arg3[%c0_3, %c128], %2 {strides = array<i32>} : memref<8x768xf32, #tpu.memory_space<vmem>>, vector<4x256xf32>,
    %c4 = arith.constant 4 : index
    %c0_4 = arith.constant 0 : index
    %4 = vector.load %arg0[%c4, %c0_4] : memref<8x256xf32, #tpu.memory_space<vmem>>, vector<4x256xf32>
    %c0_5 = arith.constant 0 : index
    %c384 = arith.constant 384 : index
    %5 = vector.load %arg3[%c0_5, %c384] : memref<8x768xf32, #tpu.memory_space<vmem>>, vector<4x256xf32>
    tpu.vector_store %arg3[%c0_5, %c384], %4 {strides = array<i32>} : memref<8x768xf32, #tpu.memory_space<vmem>>, vector<4x256xf32>,
    %6 = tpu.iota {dimensions = array<i32: 1>} : vector<8x512xi32>
    %c4_i32 = arith.constant 4 : i32
    %7 = vector.broadcast %c4_i32 : i32 to vector<8x512xi32>
    %8 = arith.shrsi %6, %7 : vector<8x512xi32>
    %c15_i32 = arith.constant 15 : i32
    %9 = vector.broadcast %c15_i32 : i32 to vector<8x512xi32>
    %10 = arith.andi %8, %9 : vector<8x512xi32>
    %c15_i32_6 = arith.constant 15 : i32
    %11 = vector.broadcast %c15_i32_6 : i32 to vector<8x512xi32>
    %12 = arith.andi %6, %11 : vector<8x512xi32>
    %c0_7 = arith.constant 0 : index
    %c111 = arith.constant 111 : index
    %13 = vector.load %arg3[%c0_7, %c111] : memref<8x768xf32, #tpu.memory_space<vmem>>, vector<8x512xf32>
    %c1_i32 = arith.constant 1 : i32
    %14 = vector.broadcast %c1_i32 : i32 to vector<8x512xi32>
    %15 = arith.cmpi sge, %10, %14 : vector<8x512xi32>
    %c1_i32_8 = arith.constant 1 : i32
    %16 = vector.broadcast %c1_i32_8 : i32 to vector<8x512xi32>
    %17 = arith.cmpi sge, %12, %16 : vector<8x512xi32>
    %18 = arith.andi %15, %17 : vector<8x512xi1>
    %cst_9 = arith.constant 0.000000e+00 : f32
    %19 = vector.broadcast %cst_9 : f32 to vector<8x512xf32>
    %20 = arith.select %18, %13, %19 : vector<8x512xi1>, vector<8x512xf32>
    %c0_10 = arith.constant 0 : index
    %c0_11 = arith.constant 0 : index
    %21 = vector.load %arg4[%c0_10, %c0_11] : memref<80x512xf32, #tpu.memory_space<vmem>>, vector<8x512xf32>
    tpu.vector_store %arg4[%c0_10, %c0_11], %20 {strides = array<i32>} : memref<80x512xf32, #tpu.memory_space<vmem>>, vector<8x512xf32>,
    %c0_12 = arith.constant 0 : index
    %c112 = arith.constant 112 : index
    %22 = vector.load %arg3[%c0_12, %c112] : memref<8x768xf32, #tpu.memory_space<vmem>>, vector<8x512xf32>
    %c1_i32_13 = arith.constant 1 : i32
    %23 = vector.broadcast %c1_i32_13 : i32 to vector<8x512xi32>
    %24 = arith.cmpi sge, %10, %23 : vector<8x512xi32>
    %cst_14 = arith.constant 0.000000e+00 : f32
    %25 = vector.broadcast %cst_14 : f32 to vector<8x512xf32>
    %26 = arith.select %24, %22, %25 : vector<8x512xi1>, vector<8x512xf32>
    %c8 = arith.constant 8 : index
    %c0_15 = arith.constant 0 : index
    %27 = vector.load %arg4[%c8, %c0_15] : memref<80x512xf32, #tpu.memory_space<vmem>>, vector<8x512xf32>
    tpu.vector_store %arg4[%c8, %c0_15], %26 {strides = array<i32>} : memref<80x512xf32, #tpu.memory_space<vmem>>, vector<8x512xf32>,
    %c0_16 = arith.constant 0 : index
    %c113 = arith.constant 113 : index
    %28 = vector.load %arg3[%c0_16, %c113] : memref<8x768xf32, #tpu.memory_space<vmem>>, vector<8x512xf32>
    %c1_i32_17 = arith.constant 1 : i32
    %29 = vector.broadcast %c1_i32_17 : i32 to vector<8x512xi32>
    %30 = arith.cmpi sge, %10, %29 : vector<8x512xi32>
    %c14_i32 = arith.constant 14 : i32
    %31 = vector.broadcast %c14_i32 : i32 to vector<8x512xi32>
    %32 = arith.cmpi sle, %12, %31 : vector<8x512xi32>
    %33 = arith.andi %30, %32 : vector<8x512xi1>
    %cst_18 = arith.constant 0.000000e+00 : f32
    %34 = vector.broadcast %cst_18 : f32 to vector<8x512xf32>
    %35 = arith.select %33, %28, %34 : vector<8x512xi1>, vector<8x512xf32>
    %c16 = arith.constant 16 : index
    %c0_19 = arith.constant 0 : index
    %36 = vector.load %arg4[%c16, %c0_19] : memref<80x512xf32, #tpu.memory_space<vmem>>, vector<8x512xf32>
    tpu.vector_store %arg4[%c16, %c0_19], %35 {strides = array<i32>} : memref<80x512xf32, #tpu.memory_space<vmem>>, vector<8x512xf32>,
    %c0_20 = arith.constant 0 : index
    %c127 = arith.constant 127 : index
    %37 = vector.load %arg3[%c0_20, %c127] : memref<8x768xf32, #tpu.memory_space<vmem>>, vector<8x512xf32>
    %c1_i32_21 = arith.constant 1 : i32
    %38 = vector.broadcast %c1_i32_21 : i32 to vector<8x512xi32>
    %39 = arith.cmpi sge, %12, %38 : vector<8x512xi32>
    %cst_22 = arith.constant 0.000000e+00 : f32
    %40 = vector.broadcast %cst_22 : f32 to vector<8x512xf32>
    %41 = arith.select %39, %37, %40 : vector<8x512xi1>, vector<8x512xf32>
    %c24 = arith.constant 24 : index
    %c0_23 = arith.constant 0 : index
    %42 = vector.load %arg4[%c24, %c0_23] : memref<80x512xf32, #tpu.memory_space<vmem>>, vector<8x512xf32>
    tpu.vector_store %arg4[%c24, %c0_23], %41 {strides = array<i32>} : memref<80x512xf32, #tpu.memory_space<vmem>>, vector<8x512xf32>,
    %c0_24 = arith.constant 0 : index
    %c128_25 = arith.constant 128 : index
    %43 = vector.load %arg3[%c0_24, %c128_25] : memref<8x768xf32, #tpu.memory_space<vmem>>, vector<8x512xf32>
    %c32 = arith.constant 32 : index
    %c0_26 = arith.constant 0 : index
    %44 = vector.load %arg4[%c32, %c0_26] : memref<80x512xf32, #tpu.memory_space<vmem>>, vector<8x512xf32>
    tpu.vector_store %arg4[%c32, %c0_26], %43 {strides = array<i32>} : memref<80x512xf32, #tpu.memory_space<vmem>>, vector<8x512xf32>,
    %c0_27 = arith.constant 0 : index
    %c129 = arith.constant 129 : index
    %45 = vector.load %arg3[%c0_27, %c129] : memref<8x768xf32, #tpu.memory_space<vmem>>, vector<8x512xf32>
    %c14_i32_28 = arith.constant 14 : i32
    %46 = vector.broadcast %c14_i32_28 : i32 to vector<8x512xi32>
    %47 = arith.cmpi sle, %12, %46 : vector<8x512xi32>
    %cst_29 = arith.constant 0.000000e+00 : f32
    %48 = vector.broadcast %cst_29 : f32 to vector<8x512xf32>
    %49 = arith.select %47, %45, %48 : vector<8x512xi1>, vector<8x512xf32>
    %c40 = arith.constant 40 : index
    %c0_30 = arith.constant 0 : index
    %50 = vector.load %arg4[%c40, %c0_30] : memref<80x512xf32, #tpu.memory_space<vmem>>, vector<8x512xf32>
    tpu.vector_store %arg4[%c40, %c0_30], %49 {strides = array<i32>} : memref<80x512xf32, #tpu.memory_space<vmem>>, vector<8x512xf32>,
    %c0_31 = arith.constant 0 : index
    %c143 = arith.constant 143 : index
    %51 = vector.load %arg3[%c0_31, %c143] : memref<8x768xf32, #tpu.memory_space<vmem>>, vector<8x512xf32>
    %c14_i32_32 = arith.constant 14 : i32
    %52 = vector.broadcast %c14_i32_32 : i32 to vector<8x512xi32>
    %53 = arith.cmpi sle, %10, %52 : vector<8x512xi32>
    %c1_i32_33 = arith.constant 1 : i32
    %54 = vector.broadcast %c1_i32_33 : i32 to vector<8x512xi32>
    %55 = arith.cmpi sge, %12, %54 : vector<8x512xi32>
    %56 = arith.andi %53, %55 : vector<8x512xi1>
    %cst_34 = arith.constant 0.000000e+00 : f32
    %57 = vector.broadcast %cst_34 : f32 to vector<8x512xf32>
    %58 = arith.select %56, %51, %57 : vector<8x512xi1>, vector<8x512xf32>
    %c48 = arith.constant 48 : index
    %c0_35 = arith.constant 0 : index
    %59 = vector.load %arg4[%c48, %c0_35] : memref<80x512xf32, #tpu.memory_space<vmem>>, vector<8x512xf32>
    tpu.vector_store %arg4[%c48, %c0_35], %58 {strides = array<i32>} : memref<80x512xf32, #tpu.memory_space<vmem>>, vector<8x512xf32>,
    %c0_36 = arith.constant 0 : index
    %c144 = arith.constant 144 : index
    %60 = vector.load %arg3[%c0_36, %c144] : memref<8x768xf32, #tpu.memory_space<vmem>>, vector<8x512xf32>
    %c14_i32_37 = arith.constant 14 : i32
    %61 = vector.broadcast %c14_i32_37 : i32 to vector<8x512xi32>
    %62 = arith.cmpi sle, %10, %61 : vector<8x512xi32>
    %cst_38 = arith.constant 0.000000e+00 : f32
    %63 = vector.broadcast %cst_38 : f32 to vector<8x512xf32>
    %64 = arith.select %62, %60, %63 : vector<8x512xi1>, vector<8x512xf32>
    %c56 = arith.constant 56 : index
    %c0_39 = arith.constant 0 : index
    %65 = vector.load %arg4[%c56, %c0_39] : memref<80x512xf32, #tpu.memory_space<vmem>>, vector<8x512xf32>
    tpu.vector_store %arg4[%c56, %c0_39], %64 {strides = array<i32>} : memref<80x512xf32, #tpu.memory_space<vmem>>, vector<8x512xf32>,
    %c0_40 = arith.constant 0 : index
    %c145 = arith.constant 145 : index
    %66 = vector.load %arg3[%c0_40, %c145] : memref<8x768xf32, #tpu.memory_space<vmem>>, vector<8x512xf32>
    %c14_i32_41 = arith.constant 14 : i32
    %67 = vector.broadcast %c14_i32_41 : i32 to vector<8x512xi32>
    %68 = arith.cmpi sle, %10, %67 : vector<8x512xi32>
    %c14_i32_42 = arith.constant 14 : i32
    %69 = vector.broadcast %c14_i32_42 : i32 to vector<8x512xi32>
    %70 = arith.cmpi sle, %12, %69 : vector<8x512xi32>
    %71 = arith.andi %68, %70 : vector<8x512xi1>
    %cst_43 = arith.constant 0.000000e+00 : f32
    %72 = vector.broadcast %cst_43 : f32 to vector<8x512xf32>
    %73 = arith.select %71, %66, %72 : vector<8x512xi1>, vector<8x512xf32>
    %c64 = arith.constant 64 : index
    %c0_44 = arith.constant 0 : index
    %74 = vector.load %arg4[%c64, %c0_44] : memref<80x512xf32, #tpu.memory_space<vmem>>, vector<8x512xf32>
    tpu.vector_store %arg4[%c64, %c0_44], %73 {strides = array<i32>} : memref<80x512xf32, #tpu.memory_space<vmem>>, vector<8x512xf32>,
    %75 = tpu.iota {dimensions = array<i32: 0>} : vector<8x512xi32>
    %c0_i32 = arith.constant 0 : i32
    %76 = vector.broadcast %c0_i32 : i32 to vector<8x512xi32>
    %77 = arith.cmpi eq, %75, %76 : vector<8x512xi32>
    %cst_45 = arith.constant 1.000000e+00 : f32
    %cst_46 = arith.constant 0.000000e+00 : f32
    %78 = vector.broadcast %cst_45 : f32 to vector<8x512xf32>
    %79 = vector.broadcast %cst_46 : f32 to vector<8x512xf32>
    %80 = arith.select %77, %78, %79 : vector<8x512xi1>, vector<8x512xf32>
    %c72 = arith.constant 72 : index
    %c0_47 = arith.constant 0 : index
    %81 = vector.load %arg4[%c72, %c0_47] : memref<80x512xf32, #tpu.memory_space<vmem>>, vector<8x512xf32>
    tpu.vector_store %arg4[%c72, %c0_47], %80 {strides = array<i32>} : memref<80x512xf32, #tpu.memory_space<vmem>>, vector<8x512xf32>,
    %c0_48 = arith.constant 0 : index
    %c0_49 = arith.constant 0 : index
    %82 = vector.load %arg1[%c0_48, %c0_49] : memref<56x128xbf16, #tpu.memory_space<vmem>>, vector<8x80xbf16>
    %c0_50 = arith.constant 0 : index
    %c0_51 = arith.constant 0 : index
    %83 = vector.load %arg4[%c0_50, %c0_51] : memref<80x512xf32, #tpu.memory_space<vmem>>, vector<80x512xf32>
    %84 = arith.truncf %83 : vector<80x512xf32> to vector<80x512xbf16>
    %cst_52 = arith.constant dense<0.000000e+00> : vector<8x512xf32>
    %85 = tpu.matmul %82, %84, %cst_52 {dimension_numbers = #tpu.dot_dimension_numbers<[1], [0], [0], [1], [0, 0, 1, 1], [], []>} : vector<8x80xbf16>, vector<80x512xbf16>, vector<8x512xf32> -> vector<8x512xf32>
    %cst_53 = arith.constant 0.000000e+00 : f32
    %86 = vector.broadcast %cst_53 : f32 to vector<8x512xf32>
    %87 = arith.maximumf %85, %86 : vector<8x512xf32>
    %88 = tpu.iota {dimensions = array<i32: 0>} : vector<8x512xi32>
    %89 = tpu.iota {dimensions = array<i32: 1>} : vector<8x512xi32>
    %c8_i32 = arith.constant 8 : i32
    %90 = vector.broadcast %c8_i32 : i32 to vector<8x512xi32>
    %91 = arith.shrsi %89, %90 : vector<8x512xi32>
    %92 = arith.cmpi eq, %91, %88 : vector<8x512xi32>
    %cst_54 = arith.constant 3.906250e-03 : f32
    %cst_55 = arith.constant 0.000000e+00 : f32
    %93 = vector.broadcast %cst_54 : f32 to vector<8x512xf32>
    %94 = vector.broadcast %cst_55 : f32 to vector<8x512xf32>
    %95 = arith.select %92, %93, %94 : vector<8x512xi1>, vector<8x512xf32>
    %96 = arith.truncf %95 : vector<8x512xf32> to vector<8x512xbf16>
    %97 = arith.truncf %87 : vector<8x512xf32> to vector<8x512xbf16>
    %cst_56 = arith.constant dense<0.000000e+00> : vector<8x8xf32>
    %98 = tpu.matmul %96, %97, %cst_56 {dimension_numbers = #tpu.dot_dimension_numbers<[1], [1], [0], [0], [0, 0, 1, 0], [], []>} : vector<8x512xbf16>, vector<8x512xbf16>, vector<8x8xf32> -> vector<8x8xf32>
    %99 = arith.truncf %98 : vector<8x8xf32> to vector<8x8xbf16>
    %c8_57 = arith.constant 8 : index
    %c0_58 = arith.constant 0 : index
    %100 = vector.load %arg1[%c8_57, %c0_58] : memref<56x128xbf16, #tpu.memory_space<vmem>>, vector<8x32xbf16>
    %cst_59 = arith.constant dense<0.000000e+00> : vector<8x32xf32>
    %101 = tpu.matmul %99, %100, %cst_59 {dimension_numbers = #tpu.dot_dimension_numbers<[1], [0], [0], [1], [0, 0, 1, 1], [], []>} : vector<8x8xbf16>, vector<8x32xbf16>, vector<8x32xf32> -> vector<8x32xf32>
    %c48_60 = arith.constant 48 : index
    %c0_61 = arith.constant 0 : index
    %102 = vector.load %arg1[%c48_60, %c0_61] : memref<56x128xbf16, #tpu.memory_space<vmem>>, vector<1x32xbf16>
    %103 = arith.extf %102 : vector<1x32xbf16> to vector<1x32xf32>
    %104 = vector.broadcast %103 : vector<1x32xf32> to vector<8x32xf32>
    %105 = arith.addf %101, %104 : vector<8x32xf32>
    %cst_62 = arith.constant 0.000000e+00 : f32
    %106 = vector.broadcast %cst_62 : f32 to vector<8x32xf32>
    %107 = arith.maximumf %105, %106 : vector<8x32xf32>
    %108 = arith.truncf %107 : vector<8x32xf32> to vector<8x32xbf16>
    %c16_63 = arith.constant 16 : index
    %c0_64 = arith.constant 0 : index
    %109 = vector.load %arg1[%c16_63, %c0_64] : memref<56x128xbf16, #tpu.memory_space<vmem>>, vector<32x128xbf16>
    %cst_65 = arith.constant dense<0.000000e+00> : vector<8x128xf32>
    %110 = tpu.matmul %108, %109, %cst_65 {dimension_numbers = #tpu.dot_dimension_numbers<[1], [0], [0], [1], [0, 0, 1, 1], [], []>} : vector<8x32xbf16>, vector<32x128xbf16>, vector<8x128xf32> -> vector<8x128xf32>
    %c49 = arith.constant 49 : index
    %c0_66 = arith.constant 0 : index
    %111 = vector.load %arg1[%c49, %c0_66] : memref<56x128xbf16, #tpu.memory_space<vmem>>, vector<1x128xbf16>
    %112 = arith.extf %111 : vector<1x128xbf16> to vector<1x128xf32>
    %113 = vector.broadcast %112 : vector<1x128xf32> to vector<8x128xf32>
    %114 = arith.addf %110, %113 : vector<8x128xf32>
    %115 = tpu.iota {dimensions = array<i32: 1>} : vector<8x128xi32>
    %cst_67 = arith.constant 0.000000e+00 : f32
    %116 = vector.broadcast %cst_67 : f32 to vector<8x128xf32>
    %117 = arith.subf %116, %114 : vector<8x128xf32>
    %118 = math.exp %117 : vector<8x128xf32>
    %cst_68 = arith.constant 1.000000e+00 : f32
    %119 = vector.broadcast %cst_68 : f32 to vector<8x128xf32>
    %120 = arith.addf %119, %118 : vector<8x128xf32>
    %121 = tpu.reciprocal %120 : vector<8x128xf32> -> vector<8x128xf32>
    %c8_i32_69 = arith.constant 8 : i32
    %122 = vector.broadcast %c8_i32_69 : i32 to vector<8x128xi32>
    %123 = arith.cmpi slt, %115, %122 : vector<8x128xi32>
    %124 = arith.select %123, %121, %114 : vector<8x128xi1>, vector<8x128xf32>
    %c0_70 = arith.constant 0 : index
    %c0_71 = arith.constant 0 : index
    %125 = vector.load %arg2[%c0_70, %c0_71] : memref<8x128xf32, #tpu.memory_space<vmem>>, vector<8x128xf32>
    tpu.vector_store %arg2[%c0_70, %c0_71], %124 {strides = array<i32>} : memref<8x128xf32, #tpu.memory_space<vmem>>, vector<8x128xf32>,
    return
  }
}

</mosaic_0001>

<bundles_post_ra>
// kernel: landmark_forward.1
= control target key start
LH: loop header
LB: loop body
LE: loop exit
PB: predicated region body
PF: predicated region fallthrough
CT: control target
= control target key end

     0   :  { %v975_v0 = vmov 0.0   ;;  %s976_s17 = smov 1   ;;  %s977_s18 = smov 17   ;;  %v983_v14 = vmov 0   ;;  %v32_v16 = vlaneseq  ;;  %vm81_vm5 = vcmask 138240   ;;  %s1426_s0 = inlined_call_operand.vmem [shape: f32[8,256], index: 0, kind: input, shape index: {}]   ;;  %s1427_s1 = inlined_call_operand.vmem [shape: bf16[56,128], index: 1, kind: input, shape index: {}]   ;;  %s1428_s2 = inlined_call_operand.vmem [shape: f32[8,128], index: 2, kind: output, shape index: {}]  }
   0x1   :  { %13 = vst [vmem:[#allocation2 + $0x8] sm:$0xff] %v975_v0  ;;  %14 = vst [vmem:[#allocation2 + $0x10] sm:$0xff] %v975_v0  ;;  %v18_v1 = vld [vmem:[%s1426_s0] sm:$0xf]  ;;  %v19_v2 = vld [vmem:[%s1426_s0 + $0x8] sm:$0xf]  ;;  %490 = vmatprep.mubr.bf16.mxu0 %v983_v14  ;;  %531 = vmatprep.mubr.bf16.mxu1 %v983_v14 }
   0x2   :  { %15 = vst [vmem:[#allocation2 + $0x18] sm:$0xff] %v975_v0  ;;  %16 = vst [vmem:[#allocation2 + $0x20] sm:$0xff] %v975_v0  ;;  %v22_v3 = vld [vmem:[%s1426_s0] sm:$0xf0]  ;;  %v23_v5 = vld [vmem:[%s1426_s0 + $0x8] sm:$0xf0] }
   0x3   :  { %20 = vst [vmem:[#allocation2 + $0x8] sm:$0xf] %v18_v1  ;;  %21 = vst [vmem:[#allocation2 + $0x10] sm:$0xf] %v19_v2  ;;  %v26_v4 = vrot.slane %v22_v3, 4  ;;  %v27_v6 = vrot.slane %v23_v5, 4 }
   0x4   :  { %s978_s0 = smov 16   ;;  %s979_s19 = smov 15   ;;  %v1045_v17 = vand.u32 127, %v32_v16  ;;  %vm118_vm6 = vcmask 130048   ;;  %vm1430_vm10 = vcmask 7168   ;;  %vm1429_vm11 = vcmask 121856  }
   0x5   :  { %30 = vst [vmem:[#allocation2 + $0x18] sm:$0xf] %v26_v4  ;;  %31 = vst [vmem:[#allocation2 + $0x20] sm:$0xf] %v27_v6  ;;  %s980_s20 = smov 127   ;;  %s981_s21 = smov 112  }
   0x6   :  { %s982_s22 = smov 113   ;;  %s984_s23 = smov 111   ;;  %v1048_v18 = vadd.s32 128, %v1045_v17  ;;  %v37_v20 = vshra.s32 %v1045_v17, 4  ;;  %v45_v24 = vand.u32 15, %v1045_v17  ;;  %v1068_v28 = vadd.s32 384, %v1045_v17 }
   0x7   :  { %v1086_v34 = vadd.s32 256, %v1045_v17  ;;  %v1449_v53 = vmov 0  ;;  %v986_v37 = vmov 1.0  }
   0x8   :  { %v38_v19 = vshra.s32 %v1048_v18, 4  ;;  %v46_v22 = vand.u32 15, %v1048_v18  ;;  %v1055_v23 = vand.u32 15, %v37_v20  ;;  %vm1073_vm3 = vcmp.ge.s32.totalorder %v45_v24, 1 }
   0x9   :  { %v40_v40 = vshra.s32 %v1068_v28, 4  ;;  %v39_v49 = vshra.s32 %v1086_v34, 4  ;;  %vm1127_vm13 = vcmp.le.s32.totalorder %v45_v24, 14  ;;  %v48_v56 = vand.u32 15, %v1068_v28 }
   0xa   :  { %v1020_v7 = vld [vmem:[#allocation2 + $0x8] sm:$0xff]  ;;  %v1022_v8 = vld [vmem:[#allocation2 + $0x10] sm:$0xff]  ;;  %v1052_v21 = vand.u32 15, %v38_v19  ;;  %vm1063_vm1 = vcmp.ge.s32.totalorder %v46_v22, 1  ;;  %vm54_vm2 = vcmp.ge.s32.totalorder %v1055_v23, 1  ;;  %vm1090_vm7 = vcmp.le.s32.totalorder %v46_v22, 14 }
   0xb   :  { %v904_v9 = vpack.i.bf16 %v1022_v8, %v1020_v7  ;;  %vm1099_vm8 = vmand %vm54_vm2, %vm1073_vm3  ;;  %v1450_v53 = vsel %vm1127_vm13, 4294967295, %v1449_v53  ;;  %v1139_v55 = vand.u32 15, %v40_v40  ;;  %v1166_v3 = vand.u32 15, %v39_v49 }
   0xc   :  { %v1026_v10 = vld [vmem:[#allocation2 + $0x18] sm:$0xff]  ;;  %v1033_v13 = vld [vmem:[#allocation2 + $0x20] sm:$0xff]  ;;  %vm55_vm0 = vcmp.ge.s32.totalorder %v1052_v21, 1  ;;  %vm1135_vm14 = vmpackc.low %vm54_vm2, %vm1099_vm8  ;;  %v47_v4 = vand.u32 15, %v1086_v34 }
   0xd   :  { %905 = vrot.lane.b32.xlu1 %v904_v9, %s976_s17  ;;  %890 = vrot.lane.b32.xlu0 %v904_v9, %s977_s18  ;;  %v909_v11 = vpack.i.bf16 %v1026_v10, %v975_v0  ;;  %v929_v12 = vpack.i.bf16 %v1026_v10, %v1022_v8  ;;  %v954_v15 = vpack.i.bf16 %v975_v0, %v1033_v13  ;;  %vm63_vm4 = vmand %vm55_vm0, %vm1063_vm1  ;;  %vm1436_vm8 = vcmp.ge.s32.totalorder %v1139_v55, 1 }
   0xe   :  { %vm792_vm9 = vmpackc.low %vm55_vm0, %vm63_vm4  ;;  %vm1431_vm4 = vcmask 1039360  }
   0xf   :  { %vm1120_vm12 = vmand %vm55_vm0, %vm1090_vm7 }
  0x10   :  { %vm798_vm15 = vmpackc.low %vm1063_vm1, %vm1120_vm12  ;;  %vm1432_vm12 = vcmp.ge.s32.totalorder %v1166_v3, 1 }
  0x11   :  { %910 = vrot.lane.b32.xlu1 %v909_v11, %s977_s18  ;;  %895 = vrot.lane.b32.xlu0 %v904_v9, %s978_s0  ;;  %vm1162_vm0 = vmand %vm54_vm2, %vm1127_vm13 }
  0x12   :  { %vm801_vm2 = vmpackc.low %vm1073_vm3, %vm1162_vm0 }
  0x15   :  { %915 = vrot.lane.b32.xlu1 %v909_v11, %s978_s0  ;;  %900 = vrot.lane.b32.xlu0 %v904_v9, %s979_s19 }
  0x19   :  { %925 = vrot.lane.b32.xlu1 %v909_v11, %s976_s17  ;;  %920 = vrot.lane.b32.xlu0 %v909_v11, %s979_s19 }
  0x1d   :  { %235 = vrot.lane.b32.xlu1 %v1020_v7, %s980_s20  ;;  %930 = vrot.lane.b32.xlu0 %v929_v12, %s980_s20 }
  0x21   :  { %116 = vrot.lane.b32.xlu1 %v1033_v13, %s978_s0  ;;  %79 = vrot.lane.b32.xlu0 %v1033_v13, %s977_s18 }
  0x25   :  { %940 = vrot.lane.b32.xlu1 %v929_v12, %s981_s21  ;;  %935 = vrot.lane.b32.xlu0 %v929_v12, %s982_s22 }
  0x29   :  { %317 = vrot.lane.b32.xlu1 %v1020_v7, %s981_s21  ;;  %280 = vrot.lane.b32.xlu0 %v1020_v7, %s982_s22 }
  0x2d   :  { %198 = vrot.lane.b32.xlu1 %v1033_v13, %s976_s17  ;;  %161 = vrot.lane.b32.xlu0 %v1033_v13, %s979_s19 }
  0x31   :  { %358 = vrot.lane.b32.xlu1 %v1020_v7, %s984_s23  ;;  %945 = vrot.lane.b32.xlu0 %v929_v12, %s984_s23 }
  0x35   :  { %955 = vrot.lane.b32.xlu1 %v954_v15, %s982_s22  ;;  %950 = vrot.lane.b32.xlu0 %v954_v15, %s980_s20 }
  0x39   :  { %965 = vrot.lane.b32.xlu1 %v954_v15, %s984_s23  ;;  %960 = vrot.lane.b32.xlu0 %v954_v15, %s981_s21 }
  0x7f   :  { %v1058_v25 = vpop.permute.xlu1 %905  ;;  %v1060_v26 = vpop.permute.xlu0 %890 }
  0x80   :  { %v893_v29 = vunpack.i.h.bf16 %v1060_v26  ;;  %v892_v30 = vunpack.i.l.bf16 %v1060_v26  ;;  %v908_v38 = vunpack.i.h.bf16 %v1058_v25  ;;  %v907_v41 = vunpack.i.l.bf16 %v1058_v25 }
  0x82   :  { %v83_v43 = vsel %vm81_vm5, %v892_v30, %v893_v29  ;;  %v202_v57 = vsel %vm1430_vm10, %v907_v41, %v908_v38 }
  0x83   :  { %v1077_v32 = vpop.permute.xlu1 %910  ;;  %v1079_v33 = vpop.permute.xlu0 %895 }
  0x84   :  { %v898_v35 = vunpack.i.h.bf16 %v1079_v33  ;;  %v897_v36 = vunpack.i.l.bf16 %v1079_v33  ;;  %v912_v42 = vunpack.i.l.bf16 %v1077_v32  ;;  %v913_v39 = vunpack.i.h.bf16 %v1077_v32 }
  0x86   :  { %v120_v44 = vsel %vm118_vm6, %v897_v36, %v898_v35  ;;  %v82_v59 = vsel %vm81_vm5, %v912_v42, %v892_v30 }
  0x87   :  { %v916_v45 = vpop.permute.xlu1 %915  ;;  %v1114_v46 = vpop.permute.xlu0 %900  ;;  %v793_v47 = vpack.c.bf16 %v120_v44, %v83_v43 }
  0x88   :  { %v917_v50 = vunpack.i.l.bf16 %v916_v45  ;;  %v903_v51 = vunpack.i.h.bf16 %v1114_v46  ;;  %v902_v52 = vunpack.i.l.bf16 %v1114_v46  ;;  %v918_v14 = vunpack.i.h.bf16 %v916_v45 }
  0x89   :  { %794 = vmatprep.subr.msk.bf16.mxu0 %vm792_vm9, %v793_v47  ;;  %vm1182_vm9 = vcmp.ge.s32.totalorder %v48_v56, 1 }
  0x8a   :  { %v165_v58 = vsel %vm1429_vm11, %v902_v52, %v903_v51  ;;  %v119_v60 = vsel %vm118_vm6, %v917_v50, %v897_v36  ;;  %v121_v45 = vsel %vm118_vm6, %v898_v35, %v918_v14 }
  0x8b   :  { %v799_v61 = vpack.c.bf16 %v202_v57, %v165_v58  ;;  %v1154_v62 = vpop.permute.xlu1 %925  ;;  %v1156_v63 = vpop.permute.xlu0 %920  ;;  %v796_v1 = vpack.c.bf16 %v119_v60, %v82_v59 }
  0x8c   :  { %v927_v5 = vunpack.i.l.bf16 %v1154_v62  ;;  %v922_v6 = vunpack.i.l.bf16 %v1156_v63  ;;  %v928_v31 = vunpack.i.h.bf16 %v1154_v62  ;;  %v923_v58 = vunpack.i.h.bf16 %v1156_v63 }
  0x8d   :  { %797 = vmatpush1.bf16.msk.msra.mxu0 %vm1135_vm14, %v796_v1  ;;  %vm1191_vm14 = vcmp.ge.s32.totalorder %v47_v4, 1  ;;  %v547_v63 = vshra.s32 %v1068_v28, 8 }
  0x8e   :  { %v201_v9 = vsel %vm1430_vm10, %v927_v5, %v907_v41  ;;  %v164_v11 = vsel %vm1429_vm11, %v922_v6, %v902_v52  ;;  %800 = vmatprep.subr.msk.bf16.mxu0 %vm798_vm15, %v799_v61  ;;  %vm1433_vm15 = vmmov 1   ;;  %vm65_vm11 = vmand %vm1436_vm8, %vm1182_vm9 }
  0x8f   :  { %v802_v15 = vpack.c.bf16 %v201_v9, %v164_v11  ;;  %v236_v19 = vpop.permute.xlu1 %235  ;;  %v1186_v20 = vpop.permute.xlu0 %930  ;;  %vm1200_vm0 = vmpackc.low %vm1090_vm7, %vm1433_vm15 }
  0x90   :  { %v933_v24 = vunpack.i.h.bf16 %v1186_v20  ;;  %v932_v30 = vunpack.i.l.bf16 %v1186_v20  ;;  %vm64_vm10 = vmand %vm1432_vm12, %vm1191_vm14  ;;  %vm268_vm12 = vcmp.le.s32.totalorder %v1052_v21, 14 }
  0x91   :  { %803 = vmatpush1.bf16.msk.msra.mxu0 %vm801_vm2, %v802_v15  ;;  %vm807_vm2 = vmpackc.low %vm1127_vm13, %vm1433_vm15  ;;  %vm1461_vm15 = vcmp.ge.s32.totalorder %v1166_v3, 1 }
  0x92   :  { %v246_v40 = vsel %vm1431_vm4, %v236_v19, %v932_v30  ;;  %v247_v41 = vsel %vm1431_vm4, %v932_v30, %v933_v24  ;;  %vm822_vm4 = vmpackc.low %vm1436_vm8, %vm65_vm11  ;;  %vm1437_vm11 = vcmask 916480   ;;  %vm290_vm8 = vcmask 924672  }
  0x93   :  { %v805_v42 = vpack.c.bf16 %v247_v41, %v1022_v8  ;;  %v808_v32 = vpack.c.bf16 %v246_v40, %v1020_v7  ;;  %v117_v43 = vpop.permute.xlu1 %116  ;;  %v80_v44 = vpop.permute.xlu0 %79  ;;  %v84_v8 = vsel %vm81_vm5, %v893_v29, %v913_v39  ;;  %vm825_vm13 = vmpackc.low %vm1461_vm15, %vm64_vm10  ;;  %vm1264_vm10 = vcmp.le.s32.totalorder %v48_v56, 14 }
  0x94   :  { %v122_v47 = vsel %vm118_vm6, %v918_v14, %v117_v43  ;;  %v85_v48 = vsel %vm81_vm5, %v913_v39, %v80_v44  ;;  %v826_v33 = vpack.c.bf16 %v121_v45, %v84_v8  ;;  %vm267_vm6 = vcmp.le.s32.totalorder %v1055_v23, 14 }
  0x95   :  { %806 = vmatprep.subr.msk.bf16.mxu0 %vm1200_vm0, %v805_v42  ;;  %v823_v7 = vpack.c.bf16 %v122_v47, %v85_v48  ;;  %vm272_vm0 = vmand %vm268_vm12, %vm1063_vm1  ;;  %v1303_v14 = vshrl.u32 %v32_v16, 7 }
  0x96   :  { %809 = vmatpush1.bf16.msk.msra.mxu0 %vm807_vm2, %v808_v32  ;;  %vm271_vm5 = vmand %vm267_vm6, %vm1073_vm3  ;;  %vm1272_vm3 = vcmp.le.s32.totalorder %v47_v4, 14  ;;  %vm1469_vm2 = vcmp.ge.s32.totalorder %v1166_v3, 1 }
  0x97   :  { %v1238_v35 = vpop.permute.xlu1 %940  ;;  %824 = vmatprep.subr.msk.bf16.mxu1 %vm822_vm4, %v823_v7  ;;  %v1240_v49 = vpop.permute.xlu0 %935  ;;  %vm810_vm1 = vmpackc.low %vm268_vm12, %vm272_vm0  ;;  %vm1466_vm4 = vcmp.ge.s32.totalorder %v1139_v55, 1  ;;  %v393_v7 = vld [vmem:[%s1427_s1] sm:$0xf] }
  0x98   :  { %v943_v26 = vunpack.i.h.bf16 %v1238_v35  ;;  %v942_v29 = vunpack.i.l.bf16 %v1238_v35  ;;  %v938_v50 = vunpack.i.h.bf16 %v1240_v49  ;;  %v937_v52 = vunpack.i.l.bf16 %v1240_v49  ;;  %827 = vmatpush1.bf16.msk.msra.mxu1 %vm825_vm13, %v826_v33  ;;  %vm813_vm13 = vmpackc.low %vm267_vm6, %vm271_vm5 }
  0x99   :  { %vm1284_vm15 = vmand %vm1466_vm4, %vm1264_vm10  ;;  %vm1472_vm5 = vcmask 7168  }
  0x9a   :  { %v292_v27 = vsel %vm290_vm8, %v937_v52, %v938_v50  ;;  %v329_v54 = vsel %vm1437_vm11, %v942_v29, %v943_v26  ;;  %vm1292_vm0 = vmand %vm1469_vm2, %vm1272_vm3  ;;  %v203_v4 = vsel %vm1472_vm5, %v908_v38, %v928_v31 }
  0x9b   :  { %v318_v59 = vpop.permute.xlu1 %317  ;;  %v281_v60 = vpop.permute.xlu0 %280  ;;  %v811_v61 = vpack.c.bf16 %v329_v54, %v292_v27  ;;  %vm1474_vm4 = vmmov %vm1472_vm5 }
  0x9c   :  { %v328_v2 = vsel %vm1437_vm11, %v318_v59, %v942_v29  ;;  %v291_v56 = vsel %vm290_vm8, %v281_v60, %v937_v52  ;;  %vm828_vm11 = vmpackc.low %vm1182_vm9, %vm1284_vm15  ;;  %vm1476_vm15 = vnez %v1450_v53 }
  0x9d   :  { %v814_v5 = vpack.c.bf16 %v328_v2, %v291_v56  ;;  %812 = vmatprep.subr.msk.bf16.mxu0 %vm810_vm1, %v811_v61  ;;  %vm1473_vm1 = vcmask 121856   ;;  %vm831_vm5 = vmpackc.low %vm1191_vm14, %vm1292_vm0 }
  0x9e   :  { %v166_v6 = vsel %vm1473_vm1, %v903_v51, %v923_v58  ;;  %vm1475_vm2 = vmmov %vm1473_vm1 }
  0x9f   :  { %v199_v9 = vpop.permute.xlu1 %198  ;;  %v162_v11 = vpop.permute.xlu0 %161  ;;  %815 = vmatpush1.bf16.msk.msra.mxu0 %vm813_vm13, %v814_v5  ;;  %v832_v38 = vpack.c.bf16 %v203_v4, %v166_v6  ;;  %vm368_vm13 = vcmask 908288   ;;  %vm350_vm1 = vmand %vm268_vm12, %vm1090_vm7  ;;  %vm270_vm12 = vcmp.le.s32.totalorder %v1139_v55, 14  ;;  %v544_v5 = vshra.s32 %v1045_v17, 8 }
  0xa0   :  { %v204_v15 = vsel %vm1474_vm4, %v928_v31, %v199_v9  ;;  %v167_v19 = vsel %vm1475_vm2, %v923_v58, %v162_v11  ;;  %vm1438_vm4 = vcmp.eq.s32.totalorder %v1303_v14, 0  ;;  %vm349_vm0 = vmand %vm267_vm6, %vm1476_vm15  ;;  %vm1477_vm6 = vmmov 1  }
  0xa1   :  { %v829_v25 = vpack.c.bf16 %v204_v15, %v167_v19  ;;  %vm819_vm7 = vmpackc.low %vm1438_vm4, %vm349_vm0  ;;  %vm1482_vm15 = vcmask 1039360  }
  0xa2   :  { %vm1334_vm2 = vmpackc.low %vm1264_vm10, %vm1477_vm6 }
  0xa3   :  { %v359_v46 = vpop.permute.xlu1 %358  ;;  %v946_v16 = vpop.permute.xlu0 %945  ;;  %830 = vmatprep.subr.msk.bf16.mxu1 %vm828_vm11, %v829_v25  ;;  %vm816_vm11 = vmpackc.low %vm1438_vm4, %vm350_vm1  ;;  %vm454_vm4 = vcmask 654336   ;;  %v546_v25 = vshra.s32 %v1086_v34, 8 }
  0xa4   :  { %v948_v51 = vunpack.i.h.bf16 %v946_v16  ;;  %v947_v30 = vunpack.i.l.bf16 %v946_v16  ;;  %833 = vmatpush1.bf16.msk.msra.mxu1 %vm831_vm5, %v832_v38  ;;  %vm269_vm5 = vcmp.le.s32.totalorder %v1166_v3, 14  ;;  %vm1342_vm1 = vmpackc.low %vm1272_vm3, %vm1477_vm6  ;;  %v987_v3 = vmov 0.00390625|0.00390625   ;;  %v645_v38 = vld [vmem:[%s1427_s1 + $0x4] sm:$0xf] }
  0xa5   :  { %vm1483_vm0 = vmmov %vm1482_vm15 }
  0xa6   :  { %v369_v36 = vsel %vm368_vm13, %v359_v46, %v947_v30  ;;  %v370_v39 = vsel %vm368_vm13, %v947_v30, %v948_v51 }
  0xa7   :  { %v817_v21 = vpack.c.bf16 %v986_v37, %v370_v39  ;;  %v820_v40 = vpack.c.bf16 %v986_v37, %v369_v36  ;;  %v956_v41 = vpop.permute.xlu1 %955  ;;  %v951_v42 = vpop.permute.xlu0 %950  ;;  %v969_v39 = vld [vmem:[%s1427_s1 + $0x8] sm:$0xff]  }
  0xa8   :  { %v958_v53 = vunpack.i.h.bf16 %v956_v41  ;;  %v953_v23 = vunpack.i.h.bf16 %v951_v42  ;;  %v952_v32 = vunpack.i.l.bf16 %v951_v42  ;;  %v957_v44 = vunpack.i.l.bf16 %v956_v41 }
  0xa9   :  { %818 = vmatprep.subr.msk.bf16.mxu0 %vm816_vm11, %v817_v21  ;;  %vm274_vm11 = vmand %vm270_vm12, %vm1182_vm9  ;;  %v646_v21 = vld [vmem:[%s1427_s1 + $0x18] sm:$0x1]  ;;  %v650_v41 = vsub.s32 0, %v1303_v14 }
  0xaa   :  { %v248_v47 = vsel %vm1482_vm15, %v933_v24, %v952_v32  ;;  %v249_v48 = vsel %vm1483_vm0, %v952_v32, %v953_v23  ;;  %821 = vmatpush1.bf16.msk.msra.mxu0 %vm819_vm7, %v820_v40  ;;  %v294_v8 = vsel %vm290_vm8, %v957_v44, %v958_v53  ;;  %vm273_vm7 = vmand %vm269_vm5, %vm1191_vm14  ;;  %vm1484_vm14 = vcmask 916480  }
  0xab   :  { %v835_v33 = vpack.c.bf16 %v249_v48, %v1033_v13  ;;  %v838_v20 = vpack.c.bf16 %v248_v47, %v1026_v10  ;;  %v966_v24 = vpop.permute.xlu1 %965  ;;  %v961_v29 = vpop.permute.xlu0 %960  ;;  %vm352_vm9 = vmand %vm270_vm12, %vm1264_vm10  ;;  %v293_v10 = vsel %vm290_vm8, %v938_v50, %v957_v44  ;;  %v647_v40 = vunpack.c.l.bf16 %v646_v21 }
  0xac   :  { %v968_v52 = vunpack.i.h.bf16 %v966_v24  ;;  %v967_v27 = vunpack.i.l.bf16 %v966_v24  ;;  %v963_v54 = vunpack.i.h.bf16 %v961_v29  ;;  %v962_v12 = vunpack.i.l.bf16 %v961_v29  ;;  %vm840_vm6 = vmpackc.low %vm270_vm12, %vm274_vm11 }
  0xad   :  { %778 = vmatmul.mubr.msk.bf16.vlgmr.msra.gmra.mrb[0].mxu0 %vm454_vm4, %v393_v7  ;;  %836 = vmatprep.subr.msk.bf16.mxu1 %vm1334_vm2, %v835_v33  ;;  %vm1485_vm15 = vmmov %vm1484_vm14  ;;  %vm1486_vm12 = vcmp.eq.s32.totalorder %v1303_v14, 0  ;;  %v651_v42 = vrot.slane %v647_v40, %v650_v41  ;;  %v708_v47 = vsub.s32 1, %v1303_v14 }
  0xae   :  { %v372_v13 = vsel %vm368_vm13, %v967_v27, %v968_v52  ;;  %v330_v22 = vsel %vm1484_vm14, %v943_v26, %v962_v12  ;;  %v331_v57 = vsel %vm1485_vm15, %v962_v12, %v963_v54  ;;  %839 = vmatpush1.bf16.msk.msra.mxu1 %vm1342_vm1, %v838_v20  ;;  %vm843_vm10 = vmpackc.low %vm269_vm5, %vm273_vm7  ;;  %v371_v35 = vsel %vm368_vm13, %v948_v51, %v967_v27 }
  0xaf   :  { %v847_v55 = vpack.c.bf16 %v986_v37, %v372_v13  ;;  %v841_v31 = vpack.c.bf16 %v331_v57, %v294_v8  ;;  %v844_v58 = vpack.c.bf16 %v330_v22, %v293_v10  ;;  %vm846_vm8 = vmpackc.low %vm1486_vm12, %vm352_vm9  ;;  %v850_v49 = vpack.c.bf16 %v986_v37, %v371_v35  ;;  %v970_v37 = vld [vmem:[%s1427_s1 + $0x10] sm:$0xff]  }
  0xb0   :  { %vm351_vm2 = vmand %vm269_vm5, %vm1272_vm3  ;;  %v545_v26 = vshra.s32 %v1048_v18, 8  ;;  %vm548_vm3 = vcmp.eq.s32.totalorder %v544_v5, %v1303_v14  ;;  %vm551_vm13 = vcmp.eq.s32.totalorder %v547_v63, %v1303_v14  ;;  %vm550_vm9 = vcmp.eq.s32.totalorder %v546_v25, %v1303_v14 }
  0xb1   :  { %842 = vmatprep.subr.msk.bf16.mxu1 %vm840_vm6, %v841_v31  ;;  %vm1487_vm1 = vmmov %vm1486_vm12  ;;  %vm656_vm14 = vcmask 1043456   ;;  %vm988_vm15 = vmmov 0   ;;  %vm722_vm12 = vcmask 261120   ;;  %v709_v48 = vrot.slane %v647_v40, %v708_v47 }
  0xb2   :  { %845 = vmatpush1.bf16.msk.msra.mxu1 %vm843_vm10, %v844_v58  ;;  %vm849_vm0 = vmpackc.low %vm1487_vm1, %vm351_vm2  ;;  %vm549_vm11 = vcmp.eq.s32.totalorder %v545_v26, %v1303_v14  ;;  %v658_v46 = vsel %vm656_vm14, %v645_v38, 0  ;;  %vm652_vm10 = vcmask 64512  }
  0xb3   :  { %848 = vmatprep.subr.msk.bf16.mxu1 %vm846_vm8, %v847_v55  ;;  %vm780_vm7 = vmpackc.low %vm549_vm11, %vm549_vm11  ;;  %vm771_vm8 = vcmp.lt.s32.totalorder %v1045_v17, 8 }
  0xb4   :  { %781 = vmatprep.mubr.msk.bf16.mxu0 %vm780_vm7, %v987_v3  ;;  %vm784_vm5 = vmpackc.low %vm551_vm13, %vm551_vm13 }
  0xb5   :  { %vm786_vm6 = vmpackc.low %vm550_vm9, %vm550_vm9 }
  0xb6   :  { %851 = vmatpush1.bf16.msk.msra.mxu1 %vm849_vm0, %v850_v49 }
  0xb7   :  { %857 = vmatprep.subr.bf16.mxu1 %v975_v0 }
  0xb9   :  { %779 = vmatmul.mubr.msk.bf16.vlgmr.msra.gmra.mrb[0].mxu1 %vm454_vm4, %v393_v7  ;;  %vm782_vm4 = vmpackc.low %vm548_vm3, %vm548_vm3 }
  0xba   :  { %858 = vmatpush3.bf16.msra.mxu1 %v658_v46  ;;  %859 = vmatprep.mubr.msk.bf16.mxu1 %vm988_vm15, %v975_v0 }
  0xbb   :  { %863 = vmatprep.subr.bf16.mxu1 %v975_v0 }
 0x180   :  { %v492_v50 = vpop.f32.mrb[0].mxu0 }
 0x181   :  { %v540_v59 = vmax.f32 %v492_v50, 0.0  ;;  %v494_v60 = vpop.f32.mrb[1].mxu0 }
 0x182   :  { %v541_v61 = vmax.f32 %v494_v60, 0.0  ;;  %v496_v1 = vpop.f32.mrb[2].mxu0 }
 0x183   :  { %v497_v2 = vpop.f32.mrb[3].mxu0  ;;  %v560_v62 = vpack.c.bf16 %v540_v59, %v540_v59 }
 0x184   :  { %v561_v56 = vpack.c.bf16 %v541_v61, %v541_v61 }
 0x186   :  { %564 = vmatprep.subr.bf16.mxu0 %v561_v56 }
 0x187   :  { %565 = vmatpush1.bf16.xpose.msra.mxu0 %v560_v62 }
 0x18c   :  { %v533_v18 = vpop.f32.mrb[0].mxu1 }
 0x18d   :  { %v542_v4 = vmax.f32 %v533_v18, 0.0  ;;  %v535_v6 = vpop.f32.mrb[1].mxu1 }
 0x18e   :  { %v543_v9 = vmax.f32 %v535_v6, 0.0  ;;  %v537_v11 = vpop.f32.mrb[2].mxu1  ;;  %783 = vmatmul.mubr.msk.bf16.vlgmr.msra.gmra.mrb[4].mxu0 %vm782_vm4, %v987_v3 }
 0x18f   :  { %v538_v15 = vpop.f32.mrb[3].mxu1  ;;  %785 = vmatprep.mubr.msk.bf16.mxu0 %vm784_vm5, %v987_v3  ;;  %v562_v28 = vpack.c.bf16 %v542_v4, %v542_v4 }
 0x190   :  { %v563_v19 = vpack.c.bf16 %v543_v9, %v543_v9 }
 0x192   :  { %604 = vmatprep.subr.bf16.mxu0 %v563_v19 }
 0x193   :  { %605 = vmatpush1.bf16.xpose.msra.mxu0 %v562_v28 }
 0x19a   :  { %787 = vmatmul.mubr.msk.bf16.vlgmr.msra.gmra.mrb[4].mxu0 %vm786_vm6, %v987_v3 }
 0x26d   :  { %v638_v34 = vpop.f32.mrb[4].mxu0 }
 0x26e   :  { %v644_v16 = vpack.c.bf16 %v638_v34, %v638_v34  ;;  %v640_v51 = vpop.f32.mrb[5].mxu0 }
 0x26f   :  { %v641_v30 = vpop.f32.mrb[6].mxu0 }
 0x270   :  { %v642_v36 = vpop.f32.mrb[7].mxu0  ;;  %860 = vmatmul.mubr.msk.bf16.vlgmr.msra.gmra.mrb[4].mxu1 %vm652_vm10, %v644_v16 }
 0x271   :  { %867 = vmatprep.mubr.msk.bf16.mxu1 %vm988_vm15, %v975_v0  ;;  %864 = vmatpush3.bf16.msra.mxu1 %v969_v39 }
 0x272   :  { %865 = vmatprep.subr.bf16.mxu1 %v975_v0 }
 0x275   :  { %866 = vmatpush3.bf16.msra.mxu1 %v970_v37 }
 0x343   :  { %v694_v53 = vpop.f32.mrb[4].mxu1 }
 0x344   :  { %v695_v23 = vadd.f32 %v694_v53, %v651_v42  ;;  %v861_v32 = vpop.f32.mrb[5].mxu1 }
 0x345   :  { %v697_v43 = vpop.f32.mrb[6].mxu1 }
 0x346   :  { %v700_v44 = vmax.f32 %v695_v23, 0.0  ;;  %v862_v45 = vpop.f32.mrb[7].mxu1 }
 0x348   :  { %v701_v0 = vpack.c.bf16 %v700_v44, %v700_v44 }
 0x34a   :  { %868 = vmatmul.mubr.msk.bf16.vlgmr.msra.gmra.mrb[8].mxu1 %vm722_vm12, %v701_v0 }
 0x41d   :  { %v760_v7 = vpop.f32.mrb[8].mxu1 }
 0x41e   :  { %v761_v8 = vadd.f32 %v760_v7, %v709_v48  ;;  %v869_v33 = vpop.f32.mrb[9].mxu1 }
 0x41f   :  { %v763_v20 = vpop.f32.mrb[10].mxu1 }
 0x420   :  { %v766_v24 = vsub.f32 0.0, %v761_v8  ;;  %v870_v29 = vpop.f32.mrb[11].mxu1 }
 0x422   :  { %v767_v52 = vmul.f32 1.442695, %v766_v24 }
 0x424   :  { %971 = vpow2.f32 %v767_v52 }
 0x42e   :  { %v972_v27 = vpop.eup %971 }
 0x42f   :  { %v769_v54 = vadd.f32 1.0, %v972_v27 }
 0x431   :  { %973 = vrcp.f32 %v769_v54 }
 0x43b   :  { %v974_v12 = vpop.eup %973 }
 0x43c   :  { %v772_v10 = vsel %vm771_vm8, %v974_v12, %v761_v8 }
 0x43d   :  { %773 = vst [vmem:[%s1428_s2] sm:$0xff] %v772_v10 }

</bundles_post_ra>
